<compile_context>
chip_gen: v7x
topology: tpu7x:2x2x1
jax: 0.10.0
libtpu: 0.0.40
codegen_flags: <defaults>
</compile_context>

<pallas_src>
import functools

import jax
import jax.numpy as jnp
from jax.experimental import pallas as pl
from jax.experimental.pallas import tpu as pltpu


def _physics_loss_kernel(ypT_ref, ytT_ref, out_ref, sse_acc, e_acc, *,
                         B, tiles_per_core, n_total, lambda_energy, needs_mask):
    c = pl.program_id(0)   # core-parallel axis (v7x megacore); serial elsewhere
    i = pl.program_id(1)   # sequential batch-tile (reduction) axis

    @pl.when(i == 0)
    def _init():
        sse_acc[...] = jnp.zeros_like(sse_acc)
        e_acc[...] = jnp.zeros_like(e_acc)

    yp = ypT_ref[...].astype(jnp.float32)     # (F, tb) — batch on lanes
    yt = ytT_ref[...].astype(jnp.float32)     # (F, tb)
    F, tb = yp.shape

    # --- sum of squared errors (for the mean over all B*F elements) ---
    d = yp - yt
    sq = d * d

    # --- energy constraint: sum_b (y[b,-1] - (y[b,-3] + y[b,-2]))**2 ---
    # Features are the (untiled) sublane axis, so static row indices are the
    # original negative column indices.
    e = yp[F - 1:F, :] - (yp[F - 3:F - 2, :] + yp[F - 2:F - 1, :])   # (1, tb)
    esq = e * e

    if needs_mask:
        # Mask lanes beyond the true batch size (ragged tail tile and fully-padded
        # tiles on the padded per-core schedule).  Skipped statically when the
        # schedule is exact.
        global_tile = c * tiles_per_core + i
        col = jax.lax.broadcasted_iota(jnp.int32, (1, tb), 1) + global_tile * tb
        valid = col < B                        # (1, tb)
        sq = jnp.where(valid, sq, 0.0)
        esq = jnp.where(valid, esq, 0.0)

    sse_acc[...] += sq                          # pure VPU accumulate
    e_acc[...] += esq

    @pl.when(i == pl.num_programs(1) - 1)
    def _finalize():
        # Single cross-lane/sublane reduce, only in the epilogue.
        sse = jnp.sum(sse_acc[...])
        esum = jnp.sum(e_acc[...])
        total = sse / jnp.float32(n_total) + jnp.float32(lambda_energy) * esum
        out_ref[...] = jnp.broadcast_to(total, (1, 1, 128))   # lane-dense partial


def _pick_block_b(B, F, itemsize):
    """Largest 128-multiple lane tile whose double-buffered inputs + f32
    accumulators stay under a 16 MiB budget (half of the requested 32 MiB scoped
    VMEM, leaving headroom on every chip generation)."""
    budget = 16 * 1024 * 1024
    per_col = F * (2 * 2 * itemsize) + (F + 1) * 4  # 2 inputs x 2 bufs + f32 accs
    bb = budget // per_col
    bb = max(128, (bb // 128) * 128)
    bb = min(bb, 65536)
    return B if B <= bb else bb


@functools.partial(jax.jit, static_argnames=("lambda_energy", "block_b", "num_cores"))
def physics_loss(y_pred, y_true, lambda_energy=0.1, block_b=None, num_cores=2):
    assert y_pred.shape == y_true.shape and y_pred.ndim == 2
    B, F = y_pred.shape
    assert F >= 3, "energy constraint needs at least 3 features"
    n_total = B * F

    # Lane-dense layout: features -> sublanes, batch -> lanes.
    ypT = y_pred.T
    ytT = y_true.T

    if block_b is None:
        block_b = _pick_block_b(B, F, jnp.dtype(y_pred.dtype).itemsize)
    if block_b >= B:
        block_b = B                      # single tile, full-extent lane dim
    else:
        assert block_b % 128 == 0, "tiled lane dim must be a multiple of 128"

    total_tiles = pl.cdiv(B, block_b)
    num_cores = max(1, min(num_cores, total_tiles))
    tiles_per_core = pl.cdiv(total_tiles, num_cores)
    needs_mask = (B % block_b != 0) or (tiles_per_core * num_cores != total_tiles)

    def in_map(c, i):
        # Clamp padded (beyond-last) tiles onto the last real tile; the kernel's
        # lane mask zeroes their contribution.
        return (0, jnp.minimum(c * tiles_per_core + i, total_tiles - 1))

    kernel = functools.partial(
        _physics_loss_kernel,
        B=B, tiles_per_core=tiles_per_core,
        n_total=n_total, lambda_energy=lambda_energy, needs_mask=needs_mask)

    partials = pl.pallas_call(
        kernel,
        out_shape=jax.ShapeDtypeStruct((num_cores, 1, 128), jnp.float32),
        grid_spec=pltpu.PrefetchScalarGridSpec(
            num_scalar_prefetch=0,
            grid=(num_cores, tiles_per_core),
            in_specs=[
                pl.BlockSpec((F, block_b), in_map),
                pl.BlockSpec((F, block_b), in_map),
            ],
            out_specs=pl.BlockSpec((1, 1, 128), lambda c, i: (c, 0, 0)),
            scratch_shapes=[
                pltpu.VMEM((F, block_b), jnp.float32),   # SSE partials
                pltpu.VMEM((1, block_b), jnp.float32),   # energy partials
            ],
        ),
        compiler_params=pltpu.CompilerParams(
            dimension_semantics=("parallel", "arbitrary"),
            vmem_limit_bytes=32 * 1024 * 1024,
        ),
    )(ypT, ytT)

    # Sum per-core partial losses (exact: sum_c sse_c / n_total + lam * sum_c e_c).
    return jnp.sum(partials[:, 0, 0])


def physics_loss_ref(y_pred, y_true, lambda_energy=0.1):
    yp = y_pred.astype(jnp.float32)
    yt = y_true.astype(jnp.float32)
    mse = jnp.mean((yp - yt) ** 2)
    energy = jnp.sum((yp[:, -1] - (yp[:, -3] + yp[:, -2])) ** 2)
    return mse + lambda_energy * energy


if __name__ == "__main__":
    key = jax.random.PRNGKey(0)
    k1, k2, k3, k4 = jax.random.split(key, 4)

    # Small example consistent with the module: batch=16, features=8 (F >= 3).
    B, F = 16, 8
    y_pred = jax.random.normal(k1, (B, F), dtype=jnp.float32)
    y_true = jax.random.normal(k2, (B, F), dtype=jnp.float32)

    loss = jax.block_until_ready(physics_loss(y_pred, y_true, lambda_energy=0.1))
    ref = physics_loss_ref(y_pred, y_true, lambda_energy=0.1)
    assert jnp.allclose(loss, ref, rtol=1e-5, atol=1e-5), (loss, ref)

    # Exercise the tiled / ragged-masked / multi-core / bf16 path.
    B2, F2 = 300, 8
    yp2 = jax.random.normal(k3, (B2, F2), dtype=jnp.bfloat16)
    yt2 = jax.random.normal(k4, (B2, F2), dtype=jnp.bfloat16)
    loss2 = jax.block_until_ready(
        physics_loss(yp2, yt2, lambda_energy=0.05, block_b=128, num_cores=2))
    ref2 = physics_loss_ref(yp2, yt2, lambda_energy=0.05)
    assert jnp.allclose(loss2, ref2, rtol=1e-4, atol=1e-4), (loss2, ref2)

    print("KERNEL_OK")
</pallas_src>

<mosaic_0001>
module attributes {stable_mosaic.version = 11 : i64} {
  func.func @_physics_loss_kernel(%arg0: i32, %arg1: i32, %arg2: memref<8x16xf32, #tpu.memory_space<vmem>>, %arg3: memref<8x16xf32, #tpu.memory_space<vmem>>, %arg4: memref<1x1x128xf32, #tpu.memory_space<vmem>>, %arg5: memref<8x16xf32, #tpu.memory_space<vmem>>, %arg6: memref<1x16xf32, #tpu.memory_space<vmem>>) attributes {dimension_semantics = [#tpu.dimension_semantics<parallel>, #tpu.dimension_semantics<arbitrary>], iteration_bounds = array<i64: 1, 1>, scalar_prefetch = 0 : i64, scratch_operands = 2 : i64, tpu.core_type = #tpu.core_type<tc>, window_params = [{transform_indices = @transform_0, window_bounds = array<i64: 8, 16>}, {transform_indices = @transform_1, window_bounds = array<i64: 8, 16>}, {transform_indices = @transform_2, window_bounds = array<i64: 1, 1, 128>}]} {
    %c0_i32 = arith.constant 0 : i32
    %0 = arith.cmpi eq, %arg1, %c0_i32 : i32
    %1 = arith.extui %0 : i1 to i32
    %c0_i32_0 = arith.constant 0 : i32
    %2 = arith.cmpi ne, %1, %c0_i32_0 : i32
    scf.if %2 {
      %cst = arith.constant 0.000000e+00 : f32
      %22 = vector.broadcast %cst : f32 to vector<8x16xf32>
      %c0_14 = arith.constant 0 : index
      %c0_15 = arith.constant 0 : index
      %23 = vector.load %arg5[%c0_14, %c0_15] : memref<8x16xf32, #tpu.memory_space<vmem>>, vector<8x16xf32>
      tpu.vector_store %arg5[%c0_14, %c0_15], %22 {strides = array<i32>} : memref<8x16xf32, #tpu.memory_space<vmem>>, vector<8x16xf32>,
      %cst_16 = arith.constant 0.000000e+00 : f32
      %24 = vector.broadcast %cst_16 : f32 to vector<1x16xf32>
      %c0_17 = arith.constant 0 : index
      %c0_18 = arith.constant 0 : index
      %25 = vector.load %arg6[%c0_17, %c0_18] : memref<1x16xf32, #tpu.memory_space<vmem>>, vector<1x16xf32>
      tpu.vector_store %arg6[%c0_17, %c0_18], %24 {strides = array<i32>} : memref<1x16xf32, #tpu.memory_space<vmem>>, vector<1x16xf32>,
    } else {
    }
    %c0 = arith.constant 0 : index
    %c0_1 = arith.constant 0 : index
    %3 = vector.load %arg2[%c0, %c0_1] : memref<8x16xf32, #tpu.memory_space<vmem>>, vector<8x16xf32>
    %c0_2 = arith.constant 0 : index
    %c0_3 = arith.constant 0 : index
    %4 = vector.load %arg3[%c0_2, %c0_3] : memref<8x16xf32, #tpu.memory_space<vmem>>, vector<8x16xf32>
    %5 = arith.subf %3, %4 : vector<8x16xf32>
    %6 = arith.mulf %5, %5 : vector<8x16xf32>
    %7 = vector.extract_strided_slice %3 {offsets = [7, 0], sizes = [1, 16], strides = [1, 1]} : vector<8x16xf32> to vector<1x16xf32>
    %8 = vector.extract_strided_slice %3 {offsets = [5, 0], sizes = [1, 16], strides = [1, 1]} : vector<8x16xf32> to vector<1x16xf32>
    %9 = vector.extract_strided_slice %3 {offsets = [6, 0], sizes = [1, 16], strides = [1, 1]} : vector<8x16xf32> to vector<1x16xf32>
    %10 = arith.addf %8, %9 : vector<1x16xf32>
    %11 = arith.subf %7, %10 : vector<1x16xf32>
    %12 = arith.mulf %11, %11 : vector<1x16xf32>
    %c0_4 = arith.constant 0 : index
    %c0_5 = arith.constant 0 : index
    %13 = vector.load %arg5[%c0_4, %c0_5] : memref<8x16xf32, #tpu.memory_space<vmem>>, vector<8x16xf32>
    %14 = arith.addf %13, %6 : vector<8x16xf32>
    %c0_6 = arith.constant 0 : index
    %c0_7 = arith.constant 0 : index
    %15 = vector.load %arg5[%c0_6, %c0_7] : memref<8x16xf32, #tpu.memory_space<vmem>>, vector<8x16xf32>
    tpu.vector_store %arg5[%c0_6, %c0_7], %14 {strides = array<i32>} : memref<8x16xf32, #tpu.memory_space<vmem>>, vector<8x16xf32>,
    %c0_8 = arith.constant 0 : index
    %c0_9 = arith.constant 0 : index
    %16 = vector.load %arg6[%c0_8, %c0_9] : memref<1x16xf32, #tpu.memory_space<vmem>>, vector<1x16xf32>
    %17 = arith.addf %16, %12 : vector<1x16xf32>
    %c0_10 = arith.constant 0 : index
    %c0_11 = arith.constant 0 : index
    %18 = vector.load %arg6[%c0_10, %c0_11] : memref<1x16xf32, #tpu.memory_space<vmem>>, vector<1x16xf32>
    tpu.vector_store %arg6[%c0_10, %c0_11], %17 {strides = array<i32>} : memref<1x16xf32, #tpu.memory_space<vmem>>, vector<1x16xf32>,
    %c0_i32_12 = arith.constant 0 : i32
    %19 = arith.cmpi eq, %arg1, %c0_i32_12 : i32
    %20 = arith.extui %19 : i1 to i32
    %c0_i32_13 = arith.constant 0 : i32
    %21 = arith.cmpi ne, %20, %c0_i32_13 : i32
    scf.if %21 {
      %c0_14 = arith.constant 0 : index
      %c0_15 = arith.constant 0 : index
      %22 = vector.load %arg5[%c0_14, %c0_15] : memref<8x16xf32, #tpu.memory_space<vmem>>, vector<8x16xf32>
      %23 = vector.shape_cast %22 : vector<8x16xf32> to vector<1x8x16xf32>
      %cst = arith.constant dense<0.000000e+00> : vector<1xf32>
      %24 = vector.multi_reduction <add>, %23, %cst [1, 2] : vector<1x8x16xf32> to vector<1xf32>
      %25 = vector.shape_cast %24 : vector<1xf32> to vector<1x1x1xf32>
      %26 = vector.extract %25[0, 0, 0] : f32 from vector<1x1x1xf32>
      %c0_16 = arith.constant 0 : index
      %c0_17 = arith.constant 0 : index
      %27 = vector.load %arg6[%c0_16, %c0_17] : memref<1x16xf32, #tpu.memory_space<vmem>>, vector<1x16xf32>
      %28 = vector.shape_cast %27 : vector<1x16xf32> to vector<1x1x16xf32>
      %cst_18 = arith.constant dense<0.000000e+00> : vector<1xf32>
      %29 = vector.multi_reduction <add>, %28, %cst_18 [1, 2] : vector<1x1x16xf32> to vector<1xf32>
      %30 = vector.shape_cast %29 : vector<1xf32> to vector<1x1x1xf32>
      %31 = vector.extract %30[0, 0, 0] : f32 from vector<1x1x1xf32>
      %cst_19 = arith.constant 1.280000e+02 : f32
      %32 = arith.divf %26, %cst_19 : f32
      %cst_20 = arith.constant 1.000000e-01 : f32
      %33 = arith.mulf %cst_20, %31 : f32
      %34 = arith.addf %32, %33 : f32
      %35 = vector.broadcast %34 : f32 to vector<1x1x128xf32>
      %c0_21 = arith.constant 0 : index
      %c0_22 = arith.constant 0 : index
      %c0_23 = arith.constant 0 : index
      %36 = vector.load %arg4[%c0_21, %c0_22, %c0_23] : memref<1x1x128xf32, #tpu.memory_space<vmem>>, vector<1x1x128xf32>
      tpu.vector_store %arg4[%c0_21, %c0_22, %c0_23], %35 {strides = array<i32>} : memref<1x1x128xf32, #tpu.memory_space<vmem>>, vector<1x1x128xf32>,
    } else {
    }
    return
  }
  func.func @transform_0(%arg0: i32, %arg1: i32) -> (i32, i32) {
    %c1_i32 = arith.constant 1 : i32
    %0 = arith.muli %arg0, %c1_i32 : i32
    %1 = arith.addi %0, %arg1 : i32
    %c0_i32 = arith.constant 0 : i32
    %2 = arith.minsi %1, %c0_i32 : i32
    %c0_i32_0 = arith.constant 0 : i32
    %c0_i32_1 = arith.constant 0 : i32
    return %c0_i32_0, %2 : i32, i32
  }
  func.func @transform_1(%arg0: i32, %arg1: i32) -> (i32, i32) {
    %c1_i32 = arith.constant 1 : i32
    %0 = arith.muli %arg0, %c1_i32 : i32
    %1 = arith.addi %0, %arg1 : i32
    %c0_i32 = arith.constant 0 : i32
    %2 = arith.minsi %1, %c0_i32 : i32
    %c0_i32_0 = arith.constant 0 : i32
    %c0_i32_1 = arith.constant 0 : i32
    return %c0_i32_0, %2 : i32, i32
  }
  func.func @transform_2(%arg0: i32, %arg1: i32) -> (i32, i32, i32) {
    %c0_i32 = arith.constant 0 : i32
    %c0_i32_0 = arith.constant 0 : i32
    %c0_i32_1 = arith.constant 0 : i32
    return %arg0, %c0_i32, %c0_i32_0 : i32, i32, i32
  }
}

</mosaic_0001>

<bundles_post_ra>
// kernel: physics_loss.1
= control target key start
LH: loop header
LB: loop body
LE: loop exit
PB: predicated region body
PF: predicated region fallthrough
CT: control target
= control target key end

     0   :  { %7 = vsyncpa [#allocation5], 0  ;;  %s270_s0 = inlined_call_operand.hbm [shape: f32[8,16], index: 0, kind: input, shape index: {}]   ;;  %s271_s1 = inlined_call_operand.vmem [shape: f32[8,16], index: 1, kind: input, shape index: {}]   ;;  %s272_s2 = inlined_call_operand.hbm [shape: f32[1,1,128], index: 2, kind: output, shape index: {}]  }
   0x1   :  { %8 = vsyncpa [#allocation6], 0  ;;  %s218_s9 = smov [#allocation4]   ;;  %s170_s13 = scalar_lea.hbm %s270_s0, 128 }
   0x2   :  { %s20_s10 = sshll.u32 %s218_s9, 4  ;;  %p171_p0 = scmp.ne.s32.totalorder %s270_s0, %s170_s13  ;;  %s21_s10 = int_to_ptr.vmem [resolvable:$true] %s20_s10 }
   0x3   :  { %p174_p1 = scmp.lt.u32.totalorder %s170_s13, %s270_s0 }
   0x5   :  { %p176_p2 = pnand %p174_p1, %p171_p0 }
   0x7   :  { %179 = shalt.err (!%p176_p2)
}
   0x8   :  { %s180_s18 = scalar_lea.vmem %s21_s10, 128  ;;  %p185_p4 = scmp.lt.s32.totalorder %s21_s10, %s21_s10 }
   0x9   :  { %p181_p3 = scmp.ne.s32.totalorder %s21_s10, %s180_s18  ;;  %p186_p5 = scmp.lt.s32.totalorder %s180_s18, %s180_s18 }
   0xb   :  { %p187_p6 = por %p186_p5, %p185_p4 }
   0xd   :  { %p188_p7 = pnand %p187_p6, %p181_p3 }
   0xf   :  { %191 = shalt.err (!%p188_p7)
}
  0x10   :  { %23 = dma.hbm_to_vmem [thread:$0]  %s270_s0, 128, %s21_s10, [#allocation5]  }
  0x11   :  { %214 = dma.done.wait [#allocation5], 128  }
  0x12   :  { %215 = vsyncadd [#allocation5], 4294967168  ;;  %vm63_vm0 = vcmask 130048   ;;  %vm65_vm1 = vcmask 122880   ;;  %v219_v0 = vmov 0.0   ;;  %v67_v1 = vld [vmem:[#allocation4] sm:$0xff]  ;;  %v90_v7 = vlaneseq }
  0x13   :  { %64 = vst.msk [vmem:[#allocation2] sm:$0xff] %vm63_vm0, %v219_v0  ;;  %v68_v2 = vld [vmem:[%s271_s1] sm:$0xff]  ;;  %v72_v4 = vrot.slane %v67_v1, 1  ;;  %v220_v5 = vmov 1966171168   ;;  %s221_s25 = smov [#allocation7]  }
  0x14   :  { %66 = vst.msk [vmem:[#allocation3] sm:$0x1] %vm65_vm1, %v219_v0  ;;  %v69_v3 = vsub.f32 %v67_v1, %v68_v2  ;;  %v88_v6 = vunpack.c.l.s4 %v220_v5  ;;  %v91_v14 = vshrl.u32 %v90_v7, 7  ;;  %s145_s26 = sshll.u32 %s221_s25, 4  ;;  %s146_s26 = int_to_ptr.vmem [resolvable:$true] %s145_s26 }
  0x15   :  { %v74_v10 = vadd.f32 %v72_v4, %v67_v1  ;;  %s192_s28 = scalar_lea.vmem %s146_s26, 16  ;;  %s196_s29 = scalar_lea.vmem %s146_s26, 32 }
  0x16   :  { %v70_v9 = vmul.f32 %v69_v3, %v69_v3  ;;  %v89_v13 = vunpack.c.0.s8 %v88_v6  ;;  %p193_p8 = scmp.ne.s32.totalorder %s146_s26, %s192_s28  ;;  %p197_p9 = scmp.lt.s32.totalorder %s146_s26, %s146_s26 }
  0x17   :  { %v76_v12 = vrot.slane %v74_v10, 6  ;;  %p198_p10 = scmp.lt.s32.totalorder %s196_s29, %s192_s28 }
  0x18   :  { %v92_v17 = vsub.s32 %v89_v13, %v91_v14 }
  0x19   :  { %v78_v15 = vsub.f32 %v67_v1, %v76_v12  ;;  %p199_p11 = por %p198_p10, %p197_p9 }
  0x1a   :  { %v80_v8 = vld [vmem:[#allocation2] sm:$0xff] }
  0x1b   :  { %v81_v11 = vadd.f32 %v80_v8, %v70_v9  ;;  %v79_v16 = vmul.f32 %v78_v15, %v78_v15  ;;  %v84_v24 = vld [vmem:[#allocation3] sm:$0x1]  ;;  %p200_p12 = pnand %p199_p11, %p193_p8 }
  0x1d   :  { %83 = vst.msk [vmem:[#allocation2] sm:$0xff] %vm63_vm0, %v81_v11  ;;  %v86_v18 = vcombine.high %v79_v16, %v79_v16 }
  0x1f   :  { %v93_v19 = vrot.slane %v86_v18, %v92_v17 }
  0x21   :  { %v94_v22 = vcombine.high %v93_v19, %v93_v19 }
  0x23   :  { %v101_v23 = vrot.slane %v94_v22, %v92_v17 }
  0x24   :  { %v110_v20 = vld [vmem:[#allocation2] sm:$0xff] }
  0x25   :  { %v111_v21 = vsel %vm63_vm0, %v110_v20, 0.0  ;;  %v102_v25 = vcombine.high %v101_v23, %v101_v23 }
  0x26   :  { %112 = vadd.xlane.f32.xlu0 %v111_v21 }
  0x27   :  { %v104_v26 = vadd.f32 %v102_v25, %v84_v24 }
  0x29   :  { %106 = vst.msk [vmem:[#allocation3] sm:$0x1] %vm65_vm1, %v104_v26 }
  0x30   :  { %v121_v27 = vld [vmem:[#allocation3] sm:$0x1] }
  0x31   :  { %v122_v28 = vsel %vm65_vm1, %v121_v27, 0.0 }
  0x32   :  { %123 = vadd.xlane.f32.xlu0 %v122_v28 }
  0xb3   :  { %v113_v29 = vpop.xlane.xlu0 %112 }
  0xb4   :  { %v114_v30 = vrot.slane %v113_v29, 4 }
  0xb6   :  { %v115_v31 = vadd.f32 %v114_v30, %v113_v29 }
  0xb8   :  { %v116_v32 = vrot.slane %v115_v31, 2 }
  0xba   :  { %v117_v33 = vadd.f32 %v116_v32, %v115_v31 }
  0xbc   :  { %v118_v34 = vrot.slane %v117_v33, 1 }
  0xbe   :  { %v119_v35 = vadd.f32 %v118_v34, %v117_v33 }
  0xbf   :  { %v124_v36 = vpop.xlane.xlu0 %123 }
  0xc0   :  { %162 = vpush %v119_v35  ;;  %v125_v37 = vrot.slane %v124_v36, 4 }
  0xc2   :  { %v126_v38 = vadd.f32 %v125_v37, %v124_v36 }
  0xc4   :  { %v127_v39 = vrot.slane %v126_v38, 2 }
  0xc6   :  { %v128_v40 = vadd.f32 %v127_v39, %v126_v38 }
  0xc8   :  { %v129_v41 = vrot.slane %v128_v40, 1 }
  0xca   :  { %v130_v42 = vadd.f32 %v129_v41, %v128_v40 }
  0xcc   :  { %164 = vpush %v130_v42 }
  0xf1   :  { %s163_s0 = spop %162 }
  0xf2   :  { %s134_s1 = smul.f32 0.0078125, %s163_s0 }
  0xfd   :  { %s165_s23 = spop %164 }
  0xfe   :  { %s135_s24 = smul.f32 0.1, %s165_s23 }
 0x100   :  { %s136_s27 = sadd.f32 %s135_s24, %s134_s1 }
 0x102   :  { %v137_v43 = vstv %s136_s27 }
 0x103   :  { %138 = vst [vmem:[#allocation7] sm:$0x1] %v137_v43 }
 0x104   :  { %203 = shalt.err (!%p200_p12)
}
 0x105   :  { %s204_s4 = scalar_lea.hbm %s272_s2, 16 }
 0x106   :  { %p205_p13 = scmp.ne.s32.totalorder %s272_s2, %s204_s4  ;;  %p208_p0 = scmp.lt.u32.totalorder %s204_s4, %s272_s2 }
 0x108   :  { %p210_p1 = pnand %p208_p0, %p205_p13 }
 0x10a   :  { %213 = shalt.err (!%p210_p1)
}
 0x10b   :  { %148 = dma.vmem_to_hbm [thread:$0]  %s146_s26, 16, %s272_s2, [#allocation6]  }
 0x10c   :  { %216 = dma.done.wait [#allocation6], 16  }
 0x10d   :  { %217 = vsyncadd [#allocation6], 4294967280 }
 0x10e   :  { %152 = vsyncpa [#allocation5], 1 }
 0x10f   :  { %153 = vsyncpa [#allocation6], 1 }

</bundles_post_ra>
